<compile_context>
chip_gen: v7x
topology: tpu7x:2x2x1
jax: 0.10.0
libtpu: 0.0.40
codegen_flags: <defaults>
</compile_context>

<pallas_src>
import math

import jax
import jax.numpy as jnp
from jax import lax
from jax.experimental import pallas as pl
from jax.experimental.pallas import tpu as pltpu


_LANE_CANDIDATES = (1024, 512, 256, 128)   # lane widths (multiples of 128)
_TARGET_BLOCK_BYTES = 2 * 1024 * 1024      # ~2 MiB (f32) per input per step


def _cdiv(a, b):
    return (a + b - 1) // b


def _make_focal_loss_kernel(alpha, gamma, row_tile, lane, rows_valid, chunks,
                            binary_targets):
    gamma_is_two = float(gamma) == 2.0

    def kernel(x_ref, t_ref, o_ref, acc_ref):
        j = pl.program_id(1)

        @pl.when(j == 0)
        def _():
            acc_ref[...] = jnp.zeros_like(acc_ref)

        p = x_ref[...].astype(jnp.float32)
        t = t_ref[...].astype(jnp.float32)

        if binary_targets:
            # Hard {0,1} targets: p_t = p if t else 1-p.  1 log, no exp.
            p_t = jnp.where(t > 0.5, p, 1.0 - p)
            bce = -jnp.maximum(jnp.log(p_t), -100.0)
            pt = p_t          # == exp(-bce) except below the -100 clamp (~4e-44)
        else:
            # PyTorch binary_cross_entropy clamps each log at -100.
            log_p = jnp.maximum(jnp.log(p), -100.0)
            log_1mp = jnp.maximum(jnp.log(1.0 - p), -100.0)
            bce = -(t * log_p + (1.0 - t) * log_1mp)
            pt = jnp.exp(-bce)

        one_minus_pt = 1.0 - pt
        if gamma_is_two:
            modulator = one_minus_pt * one_minus_pt       # VPU mul, no float pow
        else:
            modulator = one_minus_pt ** gamma
        f_loss = alpha * modulator * bce

        # Row-level tail mask: rows at/after `rows_valid` belong either to the
        # stale part of a partial last block or to the clamped dummy block of
        # the odd parallel slice.  Mask the LOSS (not the inputs) so garbage ->
        # NaN/inf never reaches the accumulator; select produces exact zeros.
        bid = pl.program_id(0) * chunks + j
        row_start = bid * row_tile
        local_row = lax.broadcasted_iota(jnp.int32, (row_tile, 1), 0)
        row_ok = (row_start + local_row) < rows_valid
        f_loss = jnp.where(row_ok, f_loss, 0.0)

        # Fold the block onto a vreg-shaped (8, lane) accumulator with pure VPU
        # adds; the single cross-lane/sublane reduce runs once per slice below.
        if row_tile % 8 == 0:
            acc_ref[...] += f_loss.reshape(row_tile // 8, 8, lane).sum(axis=0)
        else:
            # Tiny single-block inputs (row_tile == full row count < 8k rows).
            acc_ref[0:1, :] += jnp.sum(f_loss, axis=0, keepdims=True)

        @pl.when(j == pl.num_programs(1) - 1)
        def _():
            o_ref[...] = jnp.sum(acc_ref[...]).reshape(1, 1, 1)

    return kernel


def focal_loss(inputs, targets, alpha=0.4, gamma=2, reduce=True,
               binary_targets=False):
    """inputs/targets: probabilities in [0, 1], any (matching) shape.

    Returns the scalar focal-loss sum (reduce=True path of the PyTorch module).
    Set binary_targets=True only for hard {0,1} targets (cheaper EUP path).
    """
    assert reduce, "only reduce=True path implemented in the kernel"
    # TODO(synk): logits=True (BCE-with-logits) and reduce=False variants not implemented.
    assert inputs.shape == targets.shape
    total = math.prod(inputs.shape)
    assert total > 0

    # Lane-dense view: widest lane in {1024..128} dividing the element count,
    # so the reshape is a free bitcast (no HBM copy).
    lane = next((c for c in _LANE_CANDIDATES if total % c == 0), None)
    if lane is None:
        # TODO(synk): element count not a multiple of 128 -- the minimal pad
        # below still costs a full copy; a manual-DMA tail (pl.ANY +
        # make_async_copy) would make this zero-copy too.  Padded zeros are
        # loss-neutral (p=0, t=0 -> bce=0, pt=1, f_loss=0).
        lane = 128
        pad = (-total) % lane
        x_flat = jnp.pad(inputs.reshape(-1), (0, pad))
        t_flat = jnp.pad(targets.reshape(-1), (0, pad))
        rows = (total + pad) // lane
        x2 = x_flat.reshape(rows, lane)
        t2 = t_flat.reshape(rows, lane)
    else:
        rows = total // lane
        x2 = inputs.reshape(rows, lane)        # free bitcast, caller dtype kept
        t2 = targets.reshape(rows, lane)

    # Block sizing: ~2 MiB (f32) per input per step; row_tile a multiple of 32
    # (bf16 / int8 sublane packing).  When a single block covers everything we
    # use the exact row count (block dim == full array dim is always legal).
    target_rows = max(32, (_TARGET_BLOCK_BYTES // (4 * lane)) // 32 * 32)
    row_tile = rows if rows <= target_rows else target_rows
    n_blocks = _cdiv(rows, row_tile)

    # Leading "parallel" axis with per-slice partial sums (summed in JAX).
    # TODO(synk): switch to pltpu.CORE_PARALLEL (and derive n_par from the real
    # core count) once verified safe on single-core chips, to guarantee
    # cross-TensorCore sharding on v7x.
    n_par = 2 if n_blocks >= 2 else 1
    chunks = _cdiv(n_blocks, n_par)
    # If n_par does not divide n_blocks, the last grid point of slice 1 is a
    # dummy: its index_map clamps to the last real block (in-bounds DMA only)
    # and the kernel's row mask zeroes its contribution.
    idx_map = lambda pi, j: (jnp.minimum(pi * chunks + j, n_blocks - 1), 0)

    kernel = _make_focal_loss_kernel(float(alpha), float(gamma), row_tile, lane,
                                     rows, chunks, binary_targets)

    bytes_in = total * (int(x2.dtype.itemsize) + int(t2.dtype.itemsize))
    partials = pl.pallas_call(
        kernel,
        out_shape=jax.ShapeDtypeStruct((n_par, 1, 1), jnp.float32),
        grid_spec=pltpu.PrefetchScalarGridSpec(
            num_scalar_prefetch=0,
            grid=(n_par, chunks),
            in_specs=[
                pl.BlockSpec((row_tile, lane), idx_map),
                pl.BlockSpec((row_tile, lane), idx_map),
            ],
            out_specs=pl.BlockSpec((1, 1, 1), lambda pi, j: (pi, 0, 0)),
            scratch_shapes=[pltpu.VMEM((8, lane), jnp.float32)],
        ),
        compiler_params=pltpu.CompilerParams(
            dimension_semantics=("parallel", "arbitrary"),
            # 2 inputs x 2 pipeline buffers x <=2 MiB blocks + elementwise
            # temporaries: well within scoped VMEM on v5e / v6e / v7x.
            vmem_limit_bytes=40 * 1024 * 1024,
        ),
        cost_estimate=pl.CostEstimate(
            flops=12 * total,
            transcendentals=(1 if binary_targets else 3) * total,
            bytes_accessed=bytes_in + 4 * n_par,
        ),
    )(x2, t2)

    return jnp.sum(partials)


def _focal_loss_ref(inputs, targets, alpha=0.4, gamma=2):
    p = inputs.astype(jnp.float32)
    t = targets.astype(jnp.float32)
    log_p = jnp.maximum(jnp.log(p), -100.0)
    log_1mp = jnp.maximum(jnp.log(1.0 - p), -100.0)
    bce = -(t * log_p + (1.0 - t) * log_1mp)
    pt = jnp.exp(-bce)
    return jnp.sum(alpha * (1.0 - pt) ** gamma * bce)


if __name__ == "__main__":
    key = jax.random.PRNGKey(0)
    k1, k2, k3, k4, k5, k6 = jax.random.split(key, 6)

    # Primary check: small NCHW prediction map (matches the module's use).
    N, C, H, W = 2, 4, 16, 16
    inputs = jax.random.uniform(k1, (N, C, H, W), dtype=jnp.float32,
                                minval=1e-4, maxval=1.0 - 1e-4)
    targets = jax.random.bernoulli(k2, p=0.5, shape=(N, C, H, W)).astype(jnp.float32)

    out = jax.block_until_ready(focal_loss(inputs, targets, alpha=0.4, gamma=2))
    ref = _focal_loss_ref(inputs, targets, alpha=0.4, gamma=2)
    assert jnp.allclose(out, ref, rtol=1e-4, atol=1e-4), (out, ref)

    # Binary-target fast path (1 log, no exp) must match for hard labels.
    out_fast = jax.block_until_ready(
        focal_loss(inputs, targets, alpha=0.4, gamma=2, binary_targets=True))
    assert jnp.allclose(out_fast, ref, rtol=1e-3, atol=1e-3), (out_fast, ref)

    # Multi-block + parallel-slice + ragged last block (no padding anywhere).
    N2, C2, H2, W2 = 8, 4, 128, 129
    inputs2 = jax.random.uniform(k3, (N2, C2, H2, W2), dtype=jnp.float32,
                                 minval=1e-4, maxval=1.0 - 1e-4)
    targets2 = jax.random.bernoulli(k4, p=0.5,
                                    shape=(N2, C2, H2, W2)).astype(jnp.float32)
    out2 = jax.block_until_ready(focal_loss(inputs2, targets2, alpha=0.4, gamma=2))
    ref2 = _focal_loss_ref(inputs2, targets2, alpha=0.4, gamma=2)
    assert jnp.allclose(out2, ref2, rtol=1e-4, atol=1e-2), (out2, ref2)

    # Element count not a multiple of 128 -> minimal-pad fallback path.
    inputs3 = jax.random.uniform(k5, (2, 3, 171), dtype=jnp.float32,
                                 minval=1e-4, maxval=1.0 - 1e-4)
    targets3 = jax.random.bernoulli(k6, p=0.5, shape=(2, 3, 171)).astype(jnp.float32)
    out3 = jax.block_until_ready(focal_loss(inputs3, targets3, alpha=0.4, gamma=2))
    ref3 = _focal_loss_ref(inputs3, targets3, alpha=0.4, gamma=2)
    assert jnp.allclose(out3, ref3, rtol=1e-4, atol=1e-4), (out3, ref3)

    print("KERNEL_OK")
</pallas_src>

<mosaic_0001>
module attributes {stable_mosaic.version = 11 : i64} {
  func.func @kernel(%arg0: i32, %arg1: i32, %arg2: memref<2x1024xf32, #tpu.memory_space<vmem>>, %arg3: memref<2x1024xf32, #tpu.memory_space<vmem>>, %arg4: memref<1x1x1xf32, #tpu.memory_space<vmem>>, %arg5: memref<8x1024xf32, #tpu.memory_space<vmem>>) attributes {dimension_semantics = [#tpu.dimension_semantics<parallel>, #tpu.dimension_semantics<arbitrary>], iteration_bounds = array<i64: 1, 1>, scalar_prefetch = 0 : i64, scratch_operands = 1 : i64, tpu.core_type = #tpu.core_type<tc>, window_params = [{transform_indices = @transform_0, window_bounds = array<i64: 2, 1024>}, {transform_indices = @transform_1, window_bounds = array<i64: 2, 1024>}, {transform_indices = @transform_2, window_bounds = array<i64: 1, 1, 1>}]} {
    %c0_i32 = arith.constant 0 : i32
    %0 = arith.cmpi eq, %arg1, %c0_i32 : i32
    %1 = arith.extui %0 : i1 to i32
    %c0_i32_0 = arith.constant 0 : i32
    %2 = arith.cmpi ne, %1, %c0_i32_0 : i32
    scf.if %2 {
      %cst_20 = arith.constant 0.000000e+00 : f32
      %49 = vector.broadcast %cst_20 : f32 to vector<8x1024xf32>
      %c0_21 = arith.constant 0 : index
      %c0_22 = arith.constant 0 : index
      %50 = vector.load %arg5[%c0_21, %c0_22] : memref<8x1024xf32, #tpu.memory_space<vmem>>, vector<8x1024xf32>
      tpu.vector_store %arg5[%c0_21, %c0_22], %49 {strides = array<i32>} : memref<8x1024xf32, #tpu.memory_space<vmem>>, vector<8x1024xf32>,
    } else {
    }
    %c0 = arith.constant 0 : index
    %c0_1 = arith.constant 0 : index
    %3 = vector.load %arg2[%c0, %c0_1] : memref<2x1024xf32, #tpu.memory_space<vmem>>, vector<2x1024xf32>
    %c0_2 = arith.constant 0 : index
    %c0_3 = arith.constant 0 : index
    %4 = vector.load %arg3[%c0_2, %c0_3] : memref<2x1024xf32, #tpu.memory_space<vmem>>, vector<2x1024xf32>
    %5 = math.log %3 : vector<2x1024xf32>
    %cst = arith.constant -1.000000e+02 : f32
    %6 = vector.broadcast %cst : f32 to vector<2x1024xf32>
    %7 = arith.maximumf %5, %6 : vector<2x1024xf32>
    %cst_4 = arith.constant 1.000000e+00 : f32
    %8 = vector.broadcast %cst_4 : f32 to vector<2x1024xf32>
    %9 = arith.subf %8, %3 : vector<2x1024xf32>
    %10 = math.log %9 : vector<2x1024xf32>
    %cst_5 = arith.constant -1.000000e+02 : f32
    %11 = vector.broadcast %cst_5 : f32 to vector<2x1024xf32>
    %12 = arith.maximumf %10, %11 : vector<2x1024xf32>
    %13 = arith.mulf %4, %7 : vector<2x1024xf32>
    %cst_6 = arith.constant 1.000000e+00 : f32
    %14 = vector.broadcast %cst_6 : f32 to vector<2x1024xf32>
    %15 = arith.subf %14, %4 : vector<2x1024xf32>
    %16 = arith.mulf %15, %12 : vector<2x1024xf32>
    %17 = arith.addf %13, %16 : vector<2x1024xf32>
    %cst_7 = arith.constant 0.000000e+00 : f32
    %18 = vector.broadcast %cst_7 : f32 to vector<2x1024xf32>
    %19 = arith.subf %18, %17 : vector<2x1024xf32>
    %cst_8 = arith.constant 0.000000e+00 : f32
    %20 = vector.broadcast %cst_8 : f32 to vector<2x1024xf32>
    %21 = arith.subf %20, %19 : vector<2x1024xf32>
    %22 = math.exp %21 : vector<2x1024xf32>
    %cst_9 = arith.constant 1.000000e+00 : f32
    %23 = vector.broadcast %cst_9 : f32 to vector<2x1024xf32>
    %24 = arith.subf %23, %22 : vector<2x1024xf32>
    %25 = arith.mulf %24, %24 : vector<2x1024xf32>
    %cst_10 = arith.constant 4.000000e-01 : f32
    %26 = vector.broadcast %cst_10 : f32 to vector<2x1024xf32>
    %27 = arith.mulf %26, %25 : vector<2x1024xf32>
    %28 = arith.mulf %27, %19 : vector<2x1024xf32>
    %c1_i32 = arith.constant 1 : i32
    %29 = arith.muli %arg0, %c1_i32 : i32
    %30 = arith.addi %29, %arg1 : i32
    %c2_i32 = arith.constant 2 : i32
    %31 = arith.muli %30, %c2_i32 : i32
    %32 = tpu.iota {dimensions = array<i32: 0>} : vector<2x1xi32>
    %33 = vector.broadcast %31 : i32 to vector<2x1xi32>
    %34 = arith.addi %33, %32 : vector<2x1xi32>
    %c2_i32_11 = arith.constant 2 : i32
    %35 = vector.broadcast %c2_i32_11 : i32 to vector<2x1xi32>
    %36 = arith.cmpi slt, %34, %35 : vector<2x1xi32>
    %cst_12 = arith.constant 0.000000e+00 : f32
    %37 = vector.shape_cast %36 : vector<2x1xi1> to vector<2x1xi1>
    %38 = vector.broadcast %37 : vector<2x1xi1> to vector<2x1024xi1>
    %39 = vector.broadcast %cst_12 : f32 to vector<2x1024xf32>
    %40 = arith.select %38, %28, %39 : vector<2x1024xi1>, vector<2x1024xf32>
    %c0_13 = arith.constant 0 : index
    %c0_14 = arith.constant 0 : index
    %41 = vector.load %arg5[%c0_13, %c0_14] : memref<8x1024xf32, #tpu.memory_space<vmem>>, vector<1x1024xf32>
    %cst_15 = arith.constant dense<0.000000e+00> : vector<1024xf32>
    %42 = vector.multi_reduction <add>, %40, %cst_15 [0] : vector<2x1024xf32> to vector<1024xf32>
    %43 = vector.shape_cast %42 : vector<1024xf32> to vector<1x1024xf32>
    %44 = arith.addf %41, %43 : vector<1x1024xf32>
    %c0_16 = arith.constant 0 : index
    %c0_17 = arith.constant 0 : index
    %45 = vector.load %arg5[%c0_16, %c0_17] : memref<8x1024xf32, #tpu.memory_space<vmem>>, vector<1x1024xf32>
    tpu.vector_store %arg5[%c0_16, %c0_17], %44 {strides = array<i32>} : memref<8x1024xf32, #tpu.memory_space<vmem>>, vector<1x1024xf32>,
    %c0_i32_18 = arith.constant 0 : i32
    %46 = arith.cmpi eq, %arg1, %c0_i32_18 : i32
    %47 = arith.extui %46 : i1 to i32
    %c0_i32_19 = arith.constant 0 : i32
    %48 = arith.cmpi ne, %47, %c0_i32_19 : i32
    scf.if %48 {
      %c0_20 = arith.constant 0 : index
      %c0_21 = arith.constant 0 : index
      %49 = vector.load %arg5[%c0_20, %c0_21] : memref<8x1024xf32, #tpu.memory_space<vmem>>, vector<8x1024xf32>
      %50 = vector.shape_cast %49 : vector<8x1024xf32> to vector<1x8x1024xf32>
      %cst_22 = arith.constant dense<0.000000e+00> : vector<1xf32>
      %51 = vector.multi_reduction <add>, %50, %cst_22 [1, 2] : vector<1x8x1024xf32> to vector<1xf32>
      %52 = vector.shape_cast %51 : vector<1xf32> to vector<1x1x1xf32>
      %53 = vector.extract %52[0, 0, 0] : f32 from vector<1x1x1xf32>
      %54 = vector.broadcast %53 : f32 to vector<1x1x1xf32>
      %c0_23 = arith.constant 0 : index
      %c0_24 = arith.constant 0 : index
      %c0_25 = arith.constant 0 : index
      %55 = vector.load %arg4[%c0_23, %c0_24, %c0_25] : memref<1x1x1xf32, #tpu.memory_space<vmem>>, vector<1x1x1xf32>
      tpu.vector_store %arg4[%c0_23, %c0_24, %c0_25], %54 {strides = array<i32>} : memref<1x1x1xf32, #tpu.memory_space<vmem>>, vector<1x1x1xf32>,
    } else {
    }
    return
  }
  func.func @transform_0(%arg0: i32, %arg1: i32) -> (i32, i32) {
    %c1_i32 = arith.constant 1 : i32
    %0 = arith.muli %arg0, %c1_i32 : i32
    %1 = arith.addi %0, %arg1 : i32
    %c0_i32 = arith.constant 0 : i32
    %2 = arith.minsi %1, %c0_i32 : i32
    %c0_i32_0 = arith.constant 0 : i32
    %c0_i32_1 = arith.constant 0 : i32
    return %2, %c0_i32_0 : i32, i32
  }
  func.func @transform_1(%arg0: i32, %arg1: i32) -> (i32, i32) {
    %c1_i32 = arith.constant 1 : i32
    %0 = arith.muli %arg0, %c1_i32 : i32
    %1 = arith.addi %0, %arg1 : i32
    %c0_i32 = arith.constant 0 : i32
    %2 = arith.minsi %1, %c0_i32 : i32
    %c0_i32_0 = arith.constant 0 : i32
    %c0_i32_1 = arith.constant 0 : i32
    return %2, %c0_i32_0 : i32, i32
  }
  func.func @transform_2(%arg0: i32, %arg1: i32) -> (i32, i32, i32) {
    %c0_i32 = arith.constant 0 : i32
    %c0_i32_0 = arith.constant 0 : i32
    %c0_i32_1 = arith.constant 0 : i32
    return %arg0, %c0_i32, %c0_i32_0 : i32, i32, i32
  }
}

</mosaic_0001>

<bundles_post_ra>
// kernel: tpu_custom_call.1
= control target key start
LH: loop header
LB: loop body
LE: loop exit
PB: predicated region body
PF: predicated region fallthrough
CT: control target
= control target key end

     0   :  { %7 = vsyncpa [#allocation4], 0  ;;  %s521_s0 = inlined_call_operand.hbm [shape: f32[2,1024], index: 0, kind: input, shape index: {}]   ;;  %s522_s1 = inlined_call_operand.hbm [shape: f32[2,1024], index: 1, kind: input, shape index: {}]   ;;  %s523_s2 = inlined_call_operand.hbm [shape: f32[1,1,1], index: 2, kind: output, shape index: {}]  }
   0x1   :  { %8 = vsyncpa [#allocation7], 0 }
   0x2   :  { %9 = vsyncpa [#allocation5], 0  ;;  %s432_s9 = smov [#allocation3]   ;;  %s433_s11 = smov [#allocation6]  }
   0x3   :  { %s22_s10 = sshll.u32 %s432_s9, 4  ;;  %s38_s12 = sshll.u32 %s433_s11, 4  ;;  %s23_s10 = int_to_ptr.vmem [resolvable:$true] %s22_s10  ;;  %s39_s12 = int_to_ptr.vmem [resolvable:$true] %s38_s12 }
   0x4   :  { %s360_s15 = scalar_lea.hbm %s521_s0, 256 }
   0x5   :  { %p361_p0 = scmp.ne.s32.totalorder %s521_s0, %s360_s15  ;;  %p364_p1 = scmp.lt.u32.totalorder %s360_s15, %s521_s0 }
   0x7   :  { %p366_p2 = pnand %p364_p1, %p361_p0 }
   0x9   :  { %369 = shalt.err (!%p366_p2)
}
   0xa   :  { %s370_s20 = scalar_lea.vmem %s23_s10, 256  ;;  %p375_p4 = scmp.lt.s32.totalorder %s23_s10, %s23_s10 }
   0xb   :  { %p371_p3 = scmp.ne.s32.totalorder %s23_s10, %s370_s20  ;;  %p376_p5 = scmp.lt.s32.totalorder %s370_s20, %s370_s20 }
   0xd   :  { %p377_p6 = por %p376_p5, %p375_p4 }
   0xf   :  { %p378_p7 = pnand %p377_p6, %p371_p3 }
  0x11   :  { %381 = shalt.err (!%p378_p7)
}
  0x12   :  { %25 = dma.hbm_to_vmem [thread:$0]  %s521_s0, 256, %s23_s10, [#allocation4]  }
  0x13   :  { %s382_s25 = scalar_lea.hbm %s522_s1, 256 }
  0x14   :  { %p383_p8 = scmp.ne.s32.totalorder %s522_s1, %s382_s25  ;;  %p386_p9 = scmp.lt.u32.totalorder %s382_s25, %s522_s1 }
  0x16   :  { %p388_p10 = pnand %p386_p9, %p383_p8 }
  0x18   :  { %391 = shalt.err (!%p388_p10)
}
  0x19   :  { %s392_s30 = scalar_lea.vmem %s39_s12, 256  ;;  %p397_p12 = scmp.lt.s32.totalorder %s39_s12, %s39_s12 }
  0x1a   :  { %p393_p11 = scmp.ne.s32.totalorder %s39_s12, %s392_s30  ;;  %p398_p13 = scmp.lt.s32.totalorder %s392_s30, %s392_s30 }
  0x1c   :  { %p399_p0 = por %p398_p13, %p397_p12 }
  0x1e   :  { %p400_p1 = pnand %p399_p0, %p393_p11 }
  0x20   :  { %403 = shalt.err (!%p400_p1)
}
  0x21   :  { %41 = dma.hbm_to_vmem [thread:$0]  %s522_s1, 256, %s39_s12, [#allocation7]  }
  0x22   :  { %426 = dma.done.wait [#allocation4], 256  }
  0x23   :  { %427 = vsyncadd [#allocation4], 4294967040 }
  0x24   :  { %428 = dma.done.wait [#allocation7], 256  }
  0x25   :  { %429 = vsyncadd [#allocation7], 4294967040  ;;  %v434_v0 = vmov 0.0   ;;  %v66_v1 = vld [vmem:[#allocation3] sm:$0xff]  ;;  %v67_v2 = vld [vmem:[#allocation3 + $0x8] sm:$0xff]  ;;  %v110_v33 = vlaneseq  ;;  %vm172_vm1 = vcmask 1041408  }
  0x26   :  { %58 = vst [vmem:[#allocation2] sm:$0xff] %v434_v0  ;;  %59 = vst [vmem:[#allocation2 + $0x8] sm:$0xff] %v434_v0  ;;  %348 = vlog2.f32 %v66_v1  ;;  %v76_v3 = vsub.f32 1.0, %v66_v1  ;;  %v77_v4 = vsub.f32 1.0, %v67_v2  ;;  %v68_v6 = vld [vmem:[#allocation6] sm:$0xff]  ;;  %v69_v8 = vld [vmem:[#allocation6 + $0x8] sm:$0xff] }
  0x27   :  { %60 = vst [vmem:[#allocation2 + $0x10] sm:$0xff] %v434_v0  ;;  %61 = vst [vmem:[#allocation2 + $0x18] sm:$0xff] %v434_v0  ;;  %350 = vlog2.f32 %v67_v2  ;;  %v86_v15 = vsub.f32 1.0, %v68_v6  ;;  %v87_v18 = vsub.f32 1.0, %v69_v8  ;;  %v435_v34 = vmov 1983009808  }
  0x28   :  { %62 = vst [vmem:[#allocation2 + $0x20] sm:$0xff] %v434_v0  ;;  %63 = vst [vmem:[#allocation2 + $0x28] sm:$0xff] %v434_v0  ;;  %352 = vlog2.f32 %v76_v3  ;;  %v121_v35 = vunpack.c.l.s4 %v435_v34  ;;  %v477_v39 = vshrl.u32 %v110_v33, 7  ;;  %v436_v48 = vmov 1966171168   ;;  %s437_s1 = smov [#allocation8]  }
  0x29   :  { %64 = vst [vmem:[#allocation2 + $0x30] sm:$0xff] %v434_v0  ;;  %65 = vst [vmem:[#allocation2 + $0x38] sm:$0xff] %v434_v0  ;;  %354 = vlog2.f32 %v77_v4  ;;  %v480_v49 = vunpack.c.l.s4 %v436_v48  ;;  %s326_s4 = sshll.u32 %s437_s1, 4  ;;  %vm318_vm2 = vcmask 0   ;;  %s327_s4 = int_to_ptr.vmem [resolvable:$true] %s326_s4 }
  0x2a   :  { %v122_v40 = vunpack.c.0.s8 %v121_v35  ;;  %vm114_vm0 = vcmp.lt.s32.totalorder %v477_v39, 2  ;;  %s404_s6 = scalar_lea.vmem %s327_s4, 16  ;;  %s408_s7 = scalar_lea.vmem %s327_s4, 32 }
  0x2b   :  { %v243_v58 = vunpack.c.0.s8 %v480_v49  ;;  %p405_p2 = scmp.ne.s32.totalorder %s327_s4, %s404_s6  ;;  %p409_p3 = scmp.lt.s32.totalorder %s327_s4, %s327_s4 }
  0x2c   :  { %v125_v45 = vsub.s32 %v122_v40, %v477_v39  ;;  %p410_p4 = scmp.lt.s32.totalorder %s408_s7, %s404_s6 }
  0x2e   :  { %p411_p5 = por %p410_p4, %p409_p3 }
  0x30   :  { %v349_v5 = vpop.eup %348  ;;  %p412_p6 = pnand %p411_p5, %p405_p2 }
  0x31   :  { %v351_v7 = vpop.eup %350  ;;  %v71_v9 = vmul.f32 0.6931472, %v349_v5 }
  0x32   :  { %v353_v10 = vpop.eup %352  ;;  %v73_v11 = vmul.f32 0.6931472, %v351_v7 }
  0x33   :  { %v355_v12 = vpop.eup %354  ;;  %v74_v13 = vmax.f32 %v71_v9, -100.0  ;;  %v79_v14 = vmul.f32 0.6931472, %v353_v10 }
  0x34   :  { %v75_v16 = vmax.f32 %v73_v11, -100.0  ;;  %v81_v17 = vmul.f32 0.6931472, %v355_v12 }
  0x35   :  { %v82_v19 = vmax.f32 %v79_v14, -100.0  ;;  %v84_v20 = vmul.f32 %v74_v13, %v68_v6 }
  0x36   :  { %v83_v21 = vmax.f32 %v81_v17, -100.0  ;;  %v85_v22 = vmul.f32 %v75_v16, %v69_v8 }
  0x37   :  { %v88_v23 = vmul.f32 %v86_v15, %v82_v19 }
  0x38   :  { %v89_v24 = vmul.f32 %v87_v18, %v83_v21 }
  0x39   :  { %v90_v25 = vadd.f32 %v88_v23, %v84_v20 }
  0x3a   :  { %v91_v26 = vadd.f32 %v89_v24, %v85_v22 }
  0x3b   :  { %v92_v27 = vsub.f32 0.0, %v90_v25 }
  0x3c   :  { %v93_v28 = vsub.f32 0.0, %v91_v26 }
  0x3d   :  { %v94_v29 = vsub.f32 0.0, %v92_v27 }
  0x3e   :  { %v95_v30 = vsub.f32 0.0, %v93_v28 }
  0x3f   :  { %v96_v31 = vmul.f32 1.442695, %v94_v29 }
  0x40   :  { %v98_v32 = vmul.f32 1.442695, %v95_v30 }
  0x41   :  { %356 = vpow2.f32 %v96_v31 }
  0x42   :  { %358 = vpow2.f32 %v98_v32 }
  0x4b   :  { %v357_v36 = vpop.eup %356 }
  0x4c   :  { %v359_v37 = vpop.eup %358  ;;  %v100_v38 = vsub.f32 1.0, %v357_v36 }
  0x4d   :  { %v101_v41 = vsub.f32 1.0, %v359_v37 }
  0x4e   :  { %v102_v42 = vmul.f32 %v100_v38, %v100_v38 }
  0x4f   :  { %v103_v43 = vmul.f32 %v101_v41, %v101_v41 }
  0x50   :  { %v104_v44 = vmul.f32 0.4, %v102_v42 }
  0x51   :  { %v105_v46 = vmul.f32 0.4, %v103_v43 }
  0x52   :  { %v106_v47 = vmul.f32 %v104_v44, %v92_v27 }
  0x53   :  { %v107_v50 = vmul.f32 %v105_v46, %v93_v28 }
  0x54   :  { %v119_v51 = vcombine.high %v106_v47, %v106_v47  ;;  %v126_v52 = vrot.slane %v106_v47, %v125_v45 }
  0x55   :  { %v136_v53 = vcombine.high %v107_v50, %v107_v50  ;;  %v143_v54 = vrot.slane %v107_v50, %v125_v45 }
  0x56   :  { %v133_v55 = vrot.slane %v119_v51, %v125_v45  ;;  %v134_v56 = vcombine.high %v126_v52, %v126_v52  ;;  %v161_v57 = vsel %vm114_vm0, %v126_v52, 0.0  ;;  %v246_v51 = vsub.s32 %v243_v58, %v477_v39 }
  0x57   :  { %v150_v59 = vrot.slane %v136_v53, %v125_v45  ;;  %v151_v60 = vcombine.high %v143_v54, %v143_v54  ;;  %v165_v61 = vsel %vm114_vm0, %v143_v54, 0.0  ;;  %v173_v62 = vsel %vm172_vm1, %v161_v57, 0.0 }
  0x58   :  { %v135_v63 = vcombine.high %v133_v55, %v133_v55  ;;  %v162_v0 = vsel %vm114_vm0, %v134_v56, 0.0  ;;  %v163_v1 = vsel %vm114_vm0, %v133_v55, 0.0  ;;  %v174_v2 = vrot.slane %v173_v62, 4 }
  0x59   :  { %v152_v3 = vcombine.high %v150_v59, %v150_v59  ;;  %v166_v4 = vsel %vm114_vm0, %v151_v60, 0.0  ;;  %v167_v5 = vsel %vm114_vm0, %v150_v59, 0.0  ;;  %v180_v6 = vsel %vm172_vm1, %v162_v0, 0.0 }
  0x5a   :  { %v164_v7 = vsel %vm114_vm0, %v135_v63, 0.0  ;;  %v175_v8 = vadd.f32 %v174_v2, %v173_v62  ;;  %v181_v9 = vrot.slane %v180_v6, 4  ;;  %v187_v10 = vsel %vm172_vm1, %v163_v1, 0.0 }
  0x5b   :  { %v168_v11 = vsel %vm114_vm0, %v152_v3, 0.0  ;;  %v188_v12 = vrot.slane %v187_v10, 4  ;;  %v194_v13 = vsel %vm172_vm1, %v164_v7, 0.0  ;;  %v201_v14 = vsel %vm172_vm1, %v165_v61, 0.0 }
  0x5c   :  { %v176_v15 = vrot.slane %v175_v8, 2  ;;  %v182_v16 = vadd.f32 %v181_v9, %v180_v6  ;;  %v195_v17 = vrot.slane %v194_v13, 4  ;;  %v202_v18 = vrot.slane %v201_v14, 4  ;;  %v170_v9 = vld [vmem:[#allocation2] ss:$8 sm:$0xf0] }
  0x5d   :  { %v189_v19 = vadd.f32 %v188_v12, %v187_v10  ;;  %v208_v20 = vsel %vm172_vm1, %v166_v4, 0.0  ;;  %v215_v21 = vsel %vm172_vm1, %v167_v5, 0.0  ;;  %v222_v22 = vsel %vm172_vm1, %v168_v11, 0.0 }
  0x5e   :  { %v177_v23 = vadd.f32 %v176_v15, %v175_v8  ;;  %v183_v24 = vrot.slane %v182_v16, 2  ;;  %v196_v25 = vadd.f32 %v195_v17, %v194_v13  ;;  %v203_v26 = vadd.f32 %v202_v18, %v201_v14  ;;  %v169_v8 = vld [vmem:[#allocation2] ss:$8 sm:$0xf] }
  0x5f   :  { %v190_v27 = vrot.slane %v189_v19, 2  ;;  %v209_v28 = vrot.slane %v208_v20, 4  ;;  %v216_v29 = vrot.slane %v215_v21, 4  ;;  %v223_v30 = vrot.slane %v222_v22, 4 }
  0x60   :  { %v178_v31 = vrot.slane %v177_v23, 1  ;;  %v184_v32 = vadd.f32 %v183_v24, %v182_v16  ;;  %v197_v33 = vrot.slane %v196_v25, 2  ;;  %v204_v34 = vrot.slane %v203_v26, 2 }
  0x61   :  { %v191_v35 = vadd.f32 %v190_v27, %v189_v19  ;;  %v210_v36 = vadd.f32 %v209_v28, %v208_v20  ;;  %v217_v37 = vadd.f32 %v216_v29, %v215_v21  ;;  %v224_v38 = vadd.f32 %v223_v30, %v222_v22 }
  0x62   :  { %v179_v40 = vadd.f32 %v178_v31, %v177_v23  ;;  %v185_v41 = vrot.slane %v184_v32, 1  ;;  %v198_v42 = vadd.f32 %v197_v33, %v196_v25  ;;  %v205_v43 = vadd.f32 %v204_v34, %v203_v26 }
  0x63   :  { %v192_v44 = vrot.slane %v191_v35, 1  ;;  %v211_v45 = vrot.slane %v210_v36, 2  ;;  %v218_v46 = vrot.slane %v217_v37, 2  ;;  %v225_v47 = vrot.slane %v224_v38, 2 }
  0x64   :  { %v186_v48 = vadd.f32 %v185_v41, %v184_v32  ;;  %v199_v49 = vrot.slane %v198_v42, 1  ;;  %v206_v50 = vrot.slane %v205_v43, 1  ;;  %v171_v12 = vor.u32 %v170_v9, %v169_v8 }
  0x65   :  { %v193_v52 = vadd.f32 %v192_v44, %v191_v35  ;;  %v212_v53 = vadd.f32 %v211_v45, %v210_v36  ;;  %v219_v54 = vadd.f32 %v218_v46, %v217_v37  ;;  %v226_v55 = vadd.f32 %v225_v47, %v224_v38 }
  0x66   :  { %v200_v56 = vadd.f32 %v199_v49, %v198_v42  ;;  %v237_v57 = vcombine.low %v179_v40, %v186_v48  ;;  %v207_v59 = vadd.f32 %v206_v50, %v205_v43 }
  0x67   :  { %v213_v60 = vrot.slane %v212_v53, 1  ;;  %v220_v61 = vrot.slane %v219_v54, 1  ;;  %v227_v62 = vrot.slane %v226_v55, 1 }
  0x68   :  { %v238_v63 = vcombine.low %v193_v52, %v200_v56  ;;  %v247_v0 = vrot.slane %v237_v57, %v246_v51 }
  0x69   :  { %v214_v1 = vadd.f32 %v213_v60, %v212_v53  ;;  %v221_v2 = vadd.f32 %v220_v61, %v219_v54  ;;  %v228_v3 = vadd.f32 %v227_v62, %v226_v55 }
  0x6a   :  { %v254_v4 = vrot.slane %v238_v63, %v246_v51 }
  0x6b   :  { %v239_v5 = vcombine.low %v207_v59, %v214_v1  ;;  %v240_v6 = vcombine.low %v221_v2, %v228_v3 }
  0x6c   :  { %v269_v7 = vcombine.low %v247_v0, %v254_v4 }
  0x6d   :  { %v261_v39 = vrot.slane %v239_v5, %v246_v51  ;;  %v268_v58 = vrot.slane %v240_v6, %v246_v51 }
  0x6e   :  { %v277_v11 = vrot.slane %v269_v7, %v246_v51 }
  0x6f   :  { %v270_v10 = vcombine.low %v261_v39, %v268_v58 }
  0x71   :  { %v284_v13 = vrot.slane %v270_v10, %v246_v51 }
  0x73   :  { %v285_v14 = vcombine.low %v277_v11, %v284_v13 }
  0x75   :  { %v287_v15 = vadd.f32 %v285_v14, %v171_v12 }
  0x77   :  { %288 = vst [vmem:[#allocation2] ss:$8 sm:$0xf] %v287_v15  ;;  %289 = vst [vmem:[#allocation2] ss:$8 sm:$0xf0] %v287_v15 }
  0x7e   :  { %v293_v16 = vld [vmem:[#allocation2] sm:$0xff]  ;;  %v294_v17 = vld [vmem:[#allocation2 + $0x8] sm:$0xff]  ;;  %v295_v18 = vld [vmem:[#allocation2 + $0x10] sm:$0xff] }
  0x7f   :  { %v301_v19 = vadd.f32 %v294_v17, %v293_v16  ;;  %v296_v20 = vld [vmem:[#allocation2 + $0x18] sm:$0xff]  ;;  %v297_v22 = vld [vmem:[#allocation2 + $0x20] sm:$0xff]  ;;  %v298_v24 = vld [vmem:[#allocation2 + $0x28] sm:$0xff] }
  0x80   :  { %v299_v26 = vld [vmem:[#allocation2 + $0x30] sm:$0xff]  ;;  %v300_v28 = vld [vmem:[#allocation2 + $0x38] sm:$0xff] }
  0x81   :  { %v302_v21 = vadd.f32 %v301_v19, %v295_v18 }
  0x83   :  { %v303_v23 = vadd.f32 %v302_v21, %v296_v20 }
  0x85   :  { %v304_v25 = vadd.f32 %v303_v23, %v297_v22 }
  0x87   :  { %v305_v27 = vadd.f32 %v304_v25, %v298_v24 }
  0x89   :  { %v306_v29 = vadd.f32 %v305_v27, %v299_v26 }
  0x8b   :  { %v307_v30 = vadd.f32 %v306_v29, %v300_v28 }
  0x8d   :  { %308 = vadd.xlane.f32.xlu0 %v307_v30 }
 0x11a   :  { %v309_v31 = vpop.xlane.xlu0 %308 }
 0x11b   :  { %v310_v32 = vrot.slane %v309_v31, 4 }
 0x11d   :  { %v311_v33 = vadd.f32 %v310_v32, %v309_v31 }
 0x11f   :  { %v312_v34 = vrot.slane %v311_v33, 2 }
 0x121   :  { %v313_v35 = vadd.f32 %v312_v34, %v311_v33 }
 0x123   :  { %v314_v36 = vrot.slane %v313_v35, 1 }
 0x125   :  { %v315_v37 = vadd.f32 %v314_v36, %v313_v35 }
 0x127   :  { %340 = vpush %v315_v37 }
 0x158   :  { %s341_s5 = spop %340 }
 0x159   :  { %v317_v38 = vstv %s341_s5 }
 0x15a   :  { %319 = vst.msk [vmem:[#allocation8] sm:$0x1] %vm318_vm2, %v317_v38 }
 0x15b   :  { %415 = shalt.err (!%p412_p6)
}
 0x15c   :  { %s416_s10 = scalar_lea.hbm %s523_s2, 16 }
 0x15d   :  { %p417_p7 = scmp.ne.s32.totalorder %s523_s2, %s416_s10  ;;  %p420_p8 = scmp.lt.u32.totalorder %s416_s10, %s523_s2 }
 0x15f   :  { %p422_p9 = pnand %p420_p8, %p417_p7 }
 0x161   :  { %425 = shalt.err (!%p422_p9)
}
 0x162   :  { %329 = dma.vmem_to_hbm [thread:$0]  %s327_s4, 16, %s523_s2, [#allocation5]  }
 0x163   :  { %430 = dma.done.wait [#allocation5], 16  }
 0x164   :  { %431 = vsyncadd [#allocation5], 4294967280 }
 0x165   :  { %333 = vsyncpa [#allocation4], 1 }
 0x166   :  { %334 = vsyncpa [#allocation7], 1 }
 0x167   :  { %335 = vsyncpa [#allocation5], 1 }

</bundles_post_ra>
